<compile_context>
chip_gen: v5e
topology: v5e:2x2
jax: 0.10.0
libtpu: 0.0.40
codegen_flags: <defaults>
</compile_context>

<pallas_src>
import jax
import jax.numpy as jnp
from jax.experimental import pallas as pl
from jax.experimental.pallas import tpu as pltpu

# ---- small, module-consistent sizes -----------------------------------------
H = 128          # hidden_size
BN = 32          # bottleneck_size of the metanet (PromptVector adapter)
K1 = 8           # 1-hop neighbors per center node
K2 = 8           # 2-hop neighbors per center node
K = K1 + K2
B = 8            # number of center nodes per group (idx length)
NB = B * K       # 128 flattened neighbor rows (all 1-hop rows, then all 2-hop rows)
BK1 = B * K1     # 64: start of the 2-hop block inside the flattened neighbors
NB_TOT = B + NB  # 136: [centers(8); 1-hop(64); 2-hop(64)] merged gather rows
C = 4            # nb_classes (balanced: B/C per class)
C_PAD = 128      # lane-dense padded class axis for the probs output
N_NODES = 32     # node-embedding table size
PER_CLASS = B // C

# ---- resident f32 slab layout (all row offsets of multi-row blocks are 8-aligned) --
ROW_EMB = 0                      # rows  0:32   node-embedding table (N_NODES, H)
ROW_WSELF = 32                   # row   32     selfprompt weight       (1, H)
ROW_WNB = 33                     # row   33     neighborsprompt weight  (1, H)
ROW_WNB2 = 34                    # row   34     neighbors_2hopprompt w  (1, H)
ROW_BU = 35                      # row   35     metanet up bias         (1, H)
ROW_BD = 36                      # row   36     metanet down bias       (1, BN) in lanes 0:BN
ROW_WU = 40                      # rows 40:72   metanet up weight wu    (BN, H)
ROW_WDT = 72                     # rows 72:104  metanet down weight wd^T (BN, H)
ROW_ONEHOT = 104                 # rows 104:112 class one-hot (8, B) in lanes 0:B
SLAB_ROWS = 112


# ------------------------------- fused kernel ---------------------------------
def _downprompt_kernel(slab_ref, ids_ref, raw_ref, probs_ref):
    eps2 = 1e-8 * 1e-8   # clamp on squared norms == max(norm, 1e-8) on the norm

    # ---- resident table / parameters ------------------------------------------
    emb = slab_ref[ROW_EMB:ROW_EMB + N_NODES, :]                        # (32, H)
    # TODO(synk): NaNs are zeroed in the whole table before the matmul-gather (a
    # matmul gather would smear NaN); the original only zeroes NaNs in prompted
    # neighbors, so center-path NaN propagation differs if the table has NaNs.
    emb = jnp.where(emb != emb, 0.0, emb)

    # ---- merged gather: [centers; 1-hop; 2-hop] via ONE one-hot matmul (MXU) ----
    ids = ids_ref[0]                                                    # (1, NB_TOT) int32
    onehot_t = (jax.lax.broadcasted_iota(jnp.int32, (N_NODES, NB_TOT), 0)
                == ids).astype(jnp.float32)                             # (32, 136)
    gathered = jax.lax.dot_general(onehot_t, emb, (((0,), (0,)), ((), ())),
                                   preferred_element_type=jnp.float32)  # (136, H)
    center = gathered[0:B, :]                                           # (8, H)
    nbs_raw = gathered[B:NB_TOT, :]                                     # (128, H)

    # ---- downstreamprompt (elementwise prompt weights) -------------------------
    w_self = slab_ref[ROW_WSELF:ROW_WSELF + 1, :]                       # (1, H)
    w_nb = slab_ref[ROW_WNB:ROW_WNB + 1, :]
    w_nb2 = slab_ref[ROW_WNB2:ROW_WNB2 + 1, :]
    ce = w_self * center                                                # (B, H)

    r_iota = jax.lax.broadcasted_iota(jnp.int32, (NB, 1), 0)            # (NB, 1)
    nbs = jnp.where(r_iota < BK1, w_nb, w_nb2) * nbs_raw                # (NB, H)
    nbs = jnp.where(nbs != nbs, 0.0, nbs)                               # NaN -> 0

    # ---- cosine-sim attention; neighbor norms folded into the small sim matrix --
    inv_cn = jax.lax.rsqrt(jnp.maximum(jnp.sum(ce * ce, -1, keepdims=True), eps2))  # (B,1)
    nbs_sq = nbs * nbs
    nn_sq_row = jax.lax.dot_general(jnp.ones((1, H), jnp.float32), nbs_sq,
                                    (((1,), (1,)), ((), ())),
                                    preferred_element_type=jnp.float32)  # (1, NB)
    inv_nn_row = jax.lax.rsqrt(jnp.maximum(nn_sq_row, eps2))             # (1, NB)
    sim = jax.lax.dot_general(ce * inv_cn, nbs, (((1,), (1,)), ((), ())),
                              preferred_element_type=jnp.float32) * inv_nn_row  # (B, NB)

    # block mask: each center attends only to its own K1 + K2 neighbor rows
    row_b = jax.lax.broadcasted_iota(jnp.int32, (B, NB), 0)
    col = jax.lax.broadcasted_iota(jnp.int32, (B, NB), 1)
    lo1 = row_b * K1
    lo2 = BK1 + row_b * K2
    own = (((col >= lo1) & (col < lo1 + K1))
           | ((col >= lo2) & (col < lo2 + K2)))                         # (B, NB)

    m = jnp.max(jnp.where(own, sim, -1e30), -1, keepdims=True)
    e = jnp.where(own, jnp.exp(sim - m), 0.0)
    att = e / jnp.sum(e, -1, keepdims=True)                             # (B, NB)

    weighted = jnp.dot(att, nbs, preferred_element_type=jnp.float32)    # (B, H)
    inputs = weighted + ce
    # TODO(synk): F.dropout(p=0.05, training=True) is stochastic; eval semantics used.

    # ---- metanet (PromptVector bottleneck adapter): up(relu(down(x))) ----------
    # TODO(synk): PromptVector is not defined in the source; assumed Linear->ReLU->Linear.
    wd_t = slab_ref[ROW_WDT:ROW_WDT + BN, :]                            # (BN, H)  = wd^T
    bd = slab_ref[ROW_BD:ROW_BD + 1, 0:BN]                              # (1, BN)
    wu = slab_ref[ROW_WU:ROW_WU + BN, :]                                # (BN, H)
    bu = slab_ref[ROW_BU:ROW_BU + 1, :]                                 # (1, H)

    h = jax.lax.dot_general(inputs, wd_t, (((1,), (1,)), ((), ())),
                            preferred_element_type=jnp.float32)          # (B, BN)
    h = jnp.maximum(h + bd, 0.0)
    prompts = jnp.dot(h, wu, preferred_element_type=jnp.float32) + bu    # (B, H)
    rawret = prompts + ce
    raw_ref[0] = rawret

    # ---- averageemb (balanced classes) + cosine sim to class means + softmax ---
    oh = slab_ref[ROW_ONEHOT:ROW_ONEHOT + 8, 0:B]                       # (8, B)
    ave = jnp.dot(oh, rawret,
                  preferred_element_type=jnp.float32) * (1.0 / PER_CLASS)  # (8, H)
    inv_rn = jax.lax.rsqrt(jnp.maximum(jnp.sum(rawret * rawret, -1, keepdims=True), eps2))
    inv_an = jax.lax.rsqrt(jnp.maximum(jnp.sum(ave * ave, -1, keepdims=True), eps2))
    sim2 = jax.lax.dot_general(rawret * inv_rn, ave * inv_an,
                               (((1,), (1,)), ((), ())),
                               preferred_element_type=jnp.float32)       # (B, 8)

    # scatter the 8 class columns into a lane-dense (B,128) tile (diag selector matmul)
    sel = (jax.lax.broadcasted_iota(jnp.int32, (8, C_PAD), 0)
           == jax.lax.broadcasted_iota(jnp.int32, (8, C_PAD), 1)).astype(jnp.float32)
    sim2p = jnp.dot(sim2, sel, preferred_element_type=jnp.float32)       # (B, C_PAD)

    cls_valid = jax.lax.broadcasted_iota(jnp.int32, (B, C_PAD), 1) < C
    m2 = jnp.max(jnp.where(cls_valid, sim2p, -1e30), -1, keepdims=True)
    e2 = jnp.where(cls_valid, jnp.exp(sim2p - m2), 0.0)
    probs_ref[0] = e2 / jnp.sum(e2, -1, keepdims=True)                   # (B, C_PAD)


# ------------------------------- packing (call ONCE, not per step) -------------
def pack_resident(embeds, params, labels):
    """Pack the embedding table + all parameters + class one-hot into one slab."""
    slab = jnp.zeros((SLAB_ROWS, H), jnp.float32)
    slab = slab.at[ROW_EMB:ROW_EMB + N_NODES, :].set(embeds.astype(jnp.float32))
    slab = slab.at[ROW_WSELF, :].set(params["w_self"][0])
    slab = slab.at[ROW_WNB, :].set(params["w_nb"][0])
    slab = slab.at[ROW_WNB2, :].set(params["w_nb2"][0])
    slab = slab.at[ROW_BU, :].set(params["bu"][0])
    slab = slab.at[ROW_BD, 0:BN].set(params["bd"][0])
    slab = slab.at[ROW_WU:ROW_WU + BN, :].set(params["wu"])
    slab = slab.at[ROW_WDT:ROW_WDT + BN, :].set(params["wd"].T)
    onehot_cb = (jnp.arange(8, dtype=jnp.int32)[:, None]
                 == labels.astype(jnp.int32)[None, :]).astype(jnp.float32)   # (8, B)
    slab = slab.at[ROW_ONEHOT:ROW_ONEHOT + 8, 0:B].set(onehot_cb)
    return slab


def pack_ids(idx, neighbors, neighbors_2hop):
    """Pack per-group node ids lane-dense: [centers(8); 1-hop(64); 2-hop(64)]."""
    idx = idx.reshape(-1, B)
    g = idx.shape[0]
    nb1 = neighbors.reshape(g, B * K1)
    nb2 = neighbors_2hop.reshape(g, B * K2)
    ids = jnp.concatenate([idx, nb1, nb2], axis=1).astype(jnp.int32)    # (G, 136)
    return ids.reshape(g, 1, NB_TOT)


# ------------------------------- batched forward --------------------------------
@jax.jit
def downprompt_forward(slab, ids):
    g = ids.shape[0]
    flops_per_group = 2 * (NB_TOT * N_NODES * H   # merged gather
                           + H * NB               # neighbor squared-norm row
                           + B * H * NB           # sim
                           + B * NB * H           # weighted neighbors
                           + B * H * BN           # metanet down
                           + B * BN * H           # metanet up
                           + 8 * B * H            # class means
                           + B * H * 8            # sim2
                           + B * 8 * C_PAD)       # lane-dense scatter
    trans_per_group = 2 * B * C_PAD + NB + 3 * B + 8
    bytes_accessed = 4 * (SLAB_ROWS * H + g * (NB_TOT + B * H + B * C_PAD))

    rawret, probs_pad = pl.pallas_call(
        _downprompt_kernel,
        out_shape=(jax.ShapeDtypeStruct((g, B, H), jnp.float32),
                   jax.ShapeDtypeStruct((g, B, C_PAD), jnp.float32)),
        grid=(g,),
        in_specs=[
            pl.BlockSpec((SLAB_ROWS, H), lambda i: (0, 0)),        # resident slab
            pl.BlockSpec((1, 1, NB_TOT), lambda i: (i, 0, 0)),     # per-group ids
        ],
        out_specs=(pl.BlockSpec((1, B, H), lambda i: (i, 0, 0)),
                   pl.BlockSpec((1, B, C_PAD), lambda i: (i, 0, 0))),
        compiler_params=pltpu.CompilerParams(dimension_semantics=("parallel",)),
        cost_estimate=pl.CostEstimate(flops=g * flops_per_group,
                                      transcendentals=g * trans_per_group,
                                      bytes_accessed=bytes_accessed),
    )(slab, ids)
    return rawret, probs_pad[:, :, :C]


# ------------------------------- reference -------------------------------------
def reference_forward(embeds, idx, neighbors, neighbors_2hop, labels, params):
    eps = 1e-8
    center = embeds[idx]                                          # (B,H)
    ce = params["w_self"] * center                                # (B,H)
    nb = params["w_nb"][None] * embeds[neighbors]                 # (B,K1,H)
    nb2 = params["w_nb2"][None] * embeds[neighbors_2hop]          # (B,K2,H)
    nb = jnp.where(nb != nb, 0.0, nb)
    nb2 = jnp.where(nb2 != nb2, 0.0, nb2)
    nbs = jnp.concatenate([nb, nb2], axis=1)                      # (B,K,H)

    cn = jnp.maximum(jnp.sqrt(jnp.sum(ce * ce, -1, keepdims=True)), eps)   # (B,1)
    nn = jnp.maximum(jnp.sqrt(jnp.sum(nbs * nbs, -1)), eps)                # (B,K)
    sim = jnp.einsum("bh,bkh->bk", ce, nbs) / (cn * nn)
    w = jax.nn.softmax(sim, axis=-1)
    weighted = jnp.einsum("bk,bkh->bh", w, nbs)
    inputs = weighted + ce
    h = jnp.maximum(inputs @ params["wd"] + params["bd"], 0.0)
    rawret = (h @ params["wu"] + params["bu"]) + ce

    onehot = (labels[None, :] == jnp.arange(C)[:, None]).astype(jnp.float32)
    ave = onehot @ rawret / (B // C)
    rn = jnp.maximum(jnp.sqrt(jnp.sum(rawret * rawret, -1, keepdims=True)), eps)
    an = jnp.maximum(jnp.sqrt(jnp.sum(ave * ave, -1, keepdims=True)), eps)
    sim2 = (rawret / rn) @ (ave / an).T
    probs = jax.nn.softmax(sim2, axis=-1)
    return rawret, probs


# --------------------------------- main ----------------------------------------
if __name__ == "__main__":
    G = 4   # number of independent B=8 node-groups batched into one pallas_call

    key = jax.random.PRNGKey(0)
    k_emb, k1, k2, k3, kd, ku, ki, kn1, kn2 = jax.random.split(key, 9)

    embeds = jax.random.normal(k_emb, (N_NODES, H), dtype=jnp.float32)
    idx = jax.random.randint(ki, (G, B), 0, N_NODES)
    neighbors = jax.random.randint(kn1, (G, B, K1), 0, N_NODES)
    neighbors_2hop = jax.random.randint(kn2, (G, B, K2), 0, N_NODES)
    labels = jnp.tile(jnp.arange(C, dtype=jnp.int32), B // C)     # balanced labels

    def xavier(k, shape):
        fan_in, fan_out = shape[-1], shape[-1]
        bound = (6.0 / (fan_in + fan_out)) ** 0.5
        return jax.random.uniform(k, shape, jnp.float32, -bound, bound)

    params = {
        "w_self": xavier(k1, (1, H)),
        "w_nb": xavier(k2, (1, H)),
        "w_nb2": xavier(k3, (1, H)),
        "wd": 0.1 * jax.random.normal(kd, (H, BN), dtype=jnp.float32),
        "bd": jnp.zeros((1, BN), dtype=jnp.float32),
        "wu": 0.1 * jax.random.normal(ku, (BN, H), dtype=jnp.float32),
        "bu": jnp.zeros((1, H), dtype=jnp.float32),
    }

    # One-time packing (hoisted out of the per-call path).
    slab = pack_resident(embeds, params, labels)
    ids = pack_ids(idx, neighbors, neighbors_2hop)

    rawret, probs = jax.block_until_ready(downprompt_forward(slab, ids))

    assert rawret.shape == (G, B, H) and probs.shape == (G, B, C)
    assert bool(jnp.all(jnp.isfinite(rawret))) and bool(jnp.all(jnp.isfinite(probs)))
    for gidx in range(G):
        rr_ref, pr_ref = reference_forward(
            embeds, idx[gidx], neighbors[gidx], neighbors_2hop[gidx], labels, params)
        assert bool(jnp.allclose(rawret[gidx], rr_ref, rtol=1e-4, atol=1e-4)), \
            f"rawret mismatch in group {gidx}"
        assert bool(jnp.allclose(probs[gidx], pr_ref, rtol=1e-4, atol=1e-4)), \
            f"probs mismatch in group {gidx}"
    assert bool(jnp.allclose(jnp.sum(probs, axis=-1), 1.0, atol=1e-5))

    print("KERNEL_OK")
</pallas_src>

<mosaic_0001>
module attributes {stable_mosaic.version = 11 : i64} {
  func.func @_downprompt_kernel(%arg0: i32, %arg1: memref<112x128xf32, #tpu.memory_space<vmem>>, %arg2: memref<1x1x136xi32, #tpu.memory_space<vmem>>, %arg3: memref<1x8x128xf32, #tpu.memory_space<vmem>>, %arg4: memref<1x8x128xf32, #tpu.memory_space<vmem>>) attributes {dimension_semantics = [#tpu.dimension_semantics<parallel>], iteration_bounds = array<i64: 4>, scalar_prefetch = 0 : i64, scratch_operands = 0 : i64, tpu.core_type = #tpu.core_type<tc>, window_params = [{pipeline_mode = #tpu.pipeline_mode<synchronous>, transform_indices = @transform_0, window_bounds = array<i64: 112, 128>}, {transform_indices = @transform_1, window_bounds = array<i64: 1, 1, 136>}, {transform_indices = @transform_2, window_bounds = array<i64: 1, 8, 128>}, {transform_indices = @transform_3, window_bounds = array<i64: 1, 8, 128>}]} {
    %c0 = arith.constant 0 : index
    %c0_0 = arith.constant 0 : index
    %0 = vector.load %arg1[%c0, %c0_0] : memref<112x128xf32, #tpu.memory_space<vmem>>, vector<32x128xf32>
    %1 = arith.cmpf one, %0, %0 : vector<32x128xf32>
    %cst = arith.constant 0.000000e+00 : f32
    %2 = vector.broadcast %cst : f32 to vector<32x128xf32>
    %3 = arith.select %1, %2, %0 : vector<32x128xi1>, vector<32x128xf32>
    %c0_1 = arith.constant 0 : index
    %c0_2 = arith.constant 0 : index
    %c0_3 = arith.constant 0 : index
    %4 = vector.load %arg2[%c0_1, %c0_2, %c0_3] : memref<1x1x136xi32, #tpu.memory_space<vmem>>, vector<1x1x136xi32>
    %5 = vector.shape_cast %4 : vector<1x1x136xi32> to vector<1x136xi32>
    %6 = tpu.iota {dimensions = array<i32: 0>} : vector<32x136xi32>
    %7 = vector.broadcast %5 : vector<1x136xi32> to vector<32x136xi32>
    %8 = arith.cmpi eq, %6, %7 : vector<32x136xi32>
    %9 = arith.extui %8 : vector<32x136xi1> to vector<32x136xi32>
    %10 = arith.sitofp %9 : vector<32x136xi32> to vector<32x136xf32>
    %cst_4 = arith.constant dense<0.000000e+00> : vector<136x128xf32>
    %11 = tpu.matmul %10, %3, %cst_4 {dimension_numbers = #tpu.dot_dimension_numbers<[0], [0], [1], [1], [0, 1, 1, 1], [], []>} : vector<32x136xf32>, vector<32x128xf32>, vector<136x128xf32> -> vector<136x128xf32>
    %12 = vector.extract_strided_slice %11 {offsets = [0, 0], sizes = [8, 128], strides = [1, 1]} : vector<136x128xf32> to vector<8x128xf32>
    %13 = vector.extract_strided_slice %11 {offsets = [8, 0], sizes = [128, 128], strides = [1, 1]} : vector<136x128xf32> to vector<128x128xf32>
    %c32 = arith.constant 32 : index
    %c0_5 = arith.constant 0 : index
    %14 = vector.load %arg1[%c32, %c0_5] : memref<112x128xf32, #tpu.memory_space<vmem>>, vector<1x128xf32>
    %c33 = arith.constant 33 : index
    %c0_6 = arith.constant 0 : index
    %15 = vector.load %arg1[%c33, %c0_6] : memref<112x128xf32, #tpu.memory_space<vmem>>, vector<1x128xf32>
    %c34 = arith.constant 34 : index
    %c0_7 = arith.constant 0 : index
    %16 = vector.load %arg1[%c34, %c0_7] : memref<112x128xf32, #tpu.memory_space<vmem>>, vector<1x128xf32>
    %17 = vector.broadcast %14 : vector<1x128xf32> to vector<8x128xf32>
    %18 = arith.mulf %17, %12 : vector<8x128xf32>
    %19 = tpu.iota {dimensions = array<i32: 0>} : vector<128x1xi32>
    %c64_i32 = arith.constant 64 : i32
    %20 = vector.broadcast %c64_i32 : i32 to vector<128x1xi32>
    %21 = arith.cmpi slt, %19, %20 : vector<128x1xi32>
    %22 = vector.shape_cast %21 : vector<128x1xi1> to vector<128x1xi1>
    %23 = vector.broadcast %22 : vector<128x1xi1> to vector<128x128xi1>
    %24 = vector.shape_cast %15 : vector<1x128xf32> to vector<1x128xf32>
    %25 = vector.broadcast %24 : vector<1x128xf32> to vector<128x128xf32>
    %26 = vector.shape_cast %16 : vector<1x128xf32> to vector<1x128xf32>
    %27 = vector.broadcast %26 : vector<1x128xf32> to vector<128x128xf32>
    %28 = arith.select %23, %25, %27 : vector<128x128xi1>, vector<128x128xf32>
    %29 = arith.mulf %28, %13 : vector<128x128xf32>
    %30 = arith.cmpf one, %29, %29 : vector<128x128xf32>
    %cst_8 = arith.constant 0.000000e+00 : f32
    %31 = vector.broadcast %cst_8 : f32 to vector<128x128xf32>
    %32 = arith.select %30, %31, %29 : vector<128x128xi1>, vector<128x128xf32>
    %33 = arith.mulf %18, %18 : vector<8x128xf32>
    %cst_9 = arith.constant dense<0.000000e+00> : vector<8xf32>
    %34 = vector.multi_reduction <add>, %33, %cst_9 [1] : vector<8x128xf32> to vector<8xf32>
    %35 = vector.shape_cast %34 : vector<8xf32> to vector<8x1xf32>
    %cst_10 = arith.constant 1.000000e-16 : f32
    %36 = vector.broadcast %cst_10 : f32 to vector<8x1xf32>
    %37 = arith.maximumf %35, %36 : vector<8x1xf32>
    %38 = math.rsqrt %37 : vector<8x1xf32>
    %39 = arith.mulf %32, %32 : vector<128x128xf32>
    %cst_11 = arith.constant 1.000000e+00 : f32
    %40 = vector.broadcast %cst_11 : f32 to vector<1x128xf32>
    %cst_12 = arith.constant dense<0.000000e+00> : vector<1x128xf32>
    %41 = tpu.matmul %40, %39, %cst_12 {dimension_numbers = #tpu.dot_dimension_numbers<[1], [1], [0], [0], [0, 0, 1, 0], [], []>} : vector<1x128xf32>, vector<128x128xf32>, vector<1x128xf32> -> vector<1x128xf32>
    %cst_13 = arith.constant 1.000000e-16 : f32
    %42 = vector.broadcast %cst_13 : f32 to vector<1x128xf32>
    %43 = arith.maximumf %41, %42 : vector<1x128xf32>
    %44 = math.rsqrt %43 : vector<1x128xf32>
    %45 = vector.broadcast %38 : vector<8x1xf32> to vector<8x128xf32>
    %46 = arith.mulf %18, %45 : vector<8x128xf32>
    %cst_14 = arith.constant dense<0.000000e+00> : vector<8x128xf32>
    %47 = tpu.matmul %46, %32, %cst_14 {dimension_numbers = #tpu.dot_dimension_numbers<[1], [1], [0], [0], [0, 0, 1, 0], [], []>} : vector<8x128xf32>, vector<128x128xf32>, vector<8x128xf32> -> vector<8x128xf32>
    %48 = vector.broadcast %44 : vector<1x128xf32> to vector<8x128xf32>
    %49 = arith.mulf %47, %48 : vector<8x128xf32>
    %50 = tpu.iota {dimensions = array<i32: 0>} : vector<8x128xi32>
    %51 = tpu.iota {dimensions = array<i32: 1>} : vector<8x128xi32>
    %c8_i32 = arith.constant 8 : i32
    %52 = vector.broadcast %c8_i32 : i32 to vector<8x128xi32>
    %53 = arith.muli %50, %52 : vector<8x128xi32>
    %c8_i32_15 = arith.constant 8 : i32
    %54 = vector.broadcast %c8_i32_15 : i32 to vector<8x128xi32>
    %55 = arith.muli %50, %54 : vector<8x128xi32>
    %c64_i32_16 = arith.constant 64 : i32
    %56 = vector.broadcast %c64_i32_16 : i32 to vector<8x128xi32>
    %57 = arith.addi %56, %55 : vector<8x128xi32>
    %58 = arith.cmpi sge, %51, %53 : vector<8x128xi32>
    %c8_i32_17 = arith.constant 8 : i32
    %59 = vector.broadcast %c8_i32_17 : i32 to vector<8x128xi32>
    %60 = arith.addi %53, %59 : vector<8x128xi32>
    %61 = arith.cmpi slt, %51, %60 : vector<8x128xi32>
    %62 = arith.andi %58, %61 : vector<8x128xi1>
    %63 = arith.cmpi sge, %51, %57 : vector<8x128xi32>
    %c8_i32_18 = arith.constant 8 : i32
    %64 = vector.broadcast %c8_i32_18 : i32 to vector<8x128xi32>
    %65 = arith.addi %57, %64 : vector<8x128xi32>
    %66 = arith.cmpi slt, %51, %65 : vector<8x128xi32>
    %67 = arith.andi %63, %66 : vector<8x128xi1>
    %68 = arith.ori %62, %67 : vector<8x128xi1>
    %cst_19 = arith.constant -1.000000e+30 : f32
    %69 = vector.broadcast %cst_19 : f32 to vector<8x128xf32>
    %70 = arith.select %68, %49, %69 : vector<8x128xi1>, vector<8x128xf32>
    %cst_20 = arith.constant dense<0xFF800000> : vector<8xf32>
    %71 = vector.multi_reduction <maximumf>, %70, %cst_20 [1] : vector<8x128xf32> to vector<8xf32>
    %72 = vector.shape_cast %71 : vector<8xf32> to vector<8x1xf32>
    %73 = vector.broadcast %72 : vector<8x1xf32> to vector<8x128xf32>
    %74 = arith.subf %49, %73 : vector<8x128xf32>
    %75 = math.exp %74 : vector<8x128xf32>
    %cst_21 = arith.constant 0.000000e+00 : f32
    %76 = vector.broadcast %cst_21 : f32 to vector<8x128xf32>
    %77 = arith.select %68, %75, %76 : vector<8x128xi1>, vector<8x128xf32>
    %cst_22 = arith.constant dense<0.000000e+00> : vector<8xf32>
    %78 = vector.multi_reduction <add>, %77, %cst_22 [1] : vector<8x128xf32> to vector<8xf32>
    %79 = vector.shape_cast %78 : vector<8xf32> to vector<8x1xf32>
    %80 = vector.broadcast %79 : vector<8x1xf32> to vector<8x128xf32>
    %81 = arith.divf %77, %80 : vector<8x128xf32>
    %cst_23 = arith.constant dense<0.000000e+00> : vector<8x128xf32>
    %82 = tpu.matmul %81, %32, %cst_23 {dimension_numbers = #tpu.dot_dimension_numbers<[1], [0], [0], [1], [0, 0, 1, 1], [], []>} : vector<8x128xf32>, vector<128x128xf32>, vector<8x128xf32> -> vector<8x128xf32>
    %83 = arith.addf %82, %18 : vector<8x128xf32>
    %c72 = arith.constant 72 : index
    %c0_24 = arith.constant 0 : index
    %84 = vector.load %arg1[%c72, %c0_24] : memref<112x128xf32, #tpu.memory_space<vmem>>, vector<32x128xf32>
    %c36 = arith.constant 36 : index
    %c0_25 = arith.constant 0 : index
    %85 = vector.load %arg1[%c36, %c0_25] : memref<112x128xf32, #tpu.memory_space<vmem>>, vector<1x32xf32>
    %c40 = arith.constant 40 : index
    %c0_26 = arith.constant 0 : index
    %86 = vector.load %arg1[%c40, %c0_26] : memref<112x128xf32, #tpu.memory_space<vmem>>, vector<32x128xf32>
    %c35 = arith.constant 35 : index
    %c0_27 = arith.constant 0 : index
    %87 = vector.load %arg1[%c35, %c0_27] : memref<112x128xf32, #tpu.memory_space<vmem>>, vector<1x128xf32>
    %cst_28 = arith.constant dense<0.000000e+00> : vector<8x32xf32>
    %88 = tpu.matmul %83, %84, %cst_28 {dimension_numbers = #tpu.dot_dimension_numbers<[1], [1], [0], [0], [0, 0, 1, 0], [], []>} : vector<8x128xf32>, vector<32x128xf32>, vector<8x32xf32> -> vector<8x32xf32>
    %89 = vector.broadcast %85 : vector<1x32xf32> to vector<8x32xf32>
    %90 = arith.addf %88, %89 : vector<8x32xf32>
    %cst_29 = arith.constant 0.000000e+00 : f32
    %91 = vector.broadcast %cst_29 : f32 to vector<8x32xf32>
    %92 = arith.maximumf %90, %91 : vector<8x32xf32>
    %cst_30 = arith.constant dense<0.000000e+00> : vector<8x128xf32>
    %93 = tpu.matmul %92, %86, %cst_30 {dimension_numbers = #tpu.dot_dimension_numbers<[1], [0], [0], [1], [0, 0, 1, 1], [], []>} : vector<8x32xf32>, vector<32x128xf32>, vector<8x128xf32> -> vector<8x128xf32>
    %94 = vector.broadcast %87 : vector<1x128xf32> to vector<8x128xf32>
    %95 = arith.addf %93, %94 : vector<8x128xf32>
    %96 = arith.addf %95, %18 : vector<8x128xf32>
    %c0_31 = arith.constant 0 : index
    %c0_32 = arith.constant 0 : index
    %c0_33 = arith.constant 0 : index
    %97 = vector.load %arg3[%c0_31, %c0_32, %c0_33] : memref<1x8x128xf32, #tpu.memory_space<vmem>>, vector<1x8x128xf32>
    %98 = vector.shape_cast %97 : vector<1x8x128xf32> to vector<8x128xf32>
    %99 = vector.shape_cast %96 : vector<8x128xf32> to vector<1x8x128xf32>
    tpu.vector_store %arg3[%c0_31, %c0_32, %c0_33], %99 {strides = array<i32>} : memref<1x8x128xf32, #tpu.memory_space<vmem>>, vector<1x8x128xf32>,
    %c104 = arith.constant 104 : index
    %c0_34 = arith.constant 0 : index
    %100 = vector.load %arg1[%c104, %c0_34] : memref<112x128xf32, #tpu.memory_space<vmem>>, vector<8x8xf32>
    %cst_35 = arith.constant dense<0.000000e+00> : vector<8x128xf32>
    %101 = tpu.matmul %100, %96, %cst_35 {dimension_numbers = #tpu.dot_dimension_numbers<[1], [0], [0], [1], [0, 0, 1, 1], [], []>} : vector<8x8xf32>, vector<8x128xf32>, vector<8x128xf32> -> vector<8x128xf32>
    %cst_36 = arith.constant 5.000000e-01 : f32
    %102 = vector.broadcast %cst_36 : f32 to vector<8x128xf32>
    %103 = arith.mulf %101, %102 : vector<8x128xf32>
    %104 = arith.mulf %96, %96 : vector<8x128xf32>
    %cst_37 = arith.constant dense<0.000000e+00> : vector<8xf32>
    %105 = vector.multi_reduction <add>, %104, %cst_37 [1] : vector<8x128xf32> to vector<8xf32>
    %106 = vector.shape_cast %105 : vector<8xf32> to vector<8x1xf32>
    %cst_38 = arith.constant 1.000000e-16 : f32
    %107 = vector.broadcast %cst_38 : f32 to vector<8x1xf32>
    %108 = arith.maximumf %106, %107 : vector<8x1xf32>
    %109 = math.rsqrt %108 : vector<8x1xf32>
    %110 = arith.mulf %103, %103 : vector<8x128xf32>
    %cst_39 = arith.constant dense<0.000000e+00> : vector<8xf32>
    %111 = vector.multi_reduction <add>, %110, %cst_39 [1] : vector<8x128xf32> to vector<8xf32>
    %112 = vector.shape_cast %111 : vector<8xf32> to vector<8x1xf32>
    %cst_40 = arith.constant 1.000000e-16 : f32
    %113 = vector.broadcast %cst_40 : f32 to vector<8x1xf32>
    %114 = arith.maximumf %112, %113 : vector<8x1xf32>
    %115 = math.rsqrt %114 : vector<8x1xf32>
    %116 = vector.broadcast %109 : vector<8x1xf32> to vector<8x128xf32>
    %117 = arith.mulf %96, %116 : vector<8x128xf32>
    %118 = vector.broadcast %115 : vector<8x1xf32> to vector<8x128xf32>
    %119 = arith.mulf %103, %118 : vector<8x128xf32>
    %cst_41 = arith.constant dense<0.000000e+00> : vector<8x8xf32>
    %120 = tpu.matmul %117, %119, %cst_41 {dimension_numbers = #tpu.dot_dimension_numbers<[1], [1], [0], [0], [0, 0, 1, 0], [], []>} : vector<8x128xf32>, vector<8x128xf32>, vector<8x8xf32> -> vector<8x8xf32>
    %121 = tpu.iota {dimensions = array<i32: 0>} : vector<8x128xi32>
    %122 = tpu.iota {dimensions = array<i32: 1>} : vector<8x128xi32>
    %123 = arith.cmpi eq, %121, %122 : vector<8x128xi32>
    %124 = arith.extui %123 : vector<8x128xi1> to vector<8x128xi32>
    %125 = arith.sitofp %124 : vector<8x128xi32> to vector<8x128xf32>
    %cst_42 = arith.constant dense<0.000000e+00> : vector<8x128xf32>
    %126 = tpu.matmul %120, %125, %cst_42 {dimension_numbers = #tpu.dot_dimension_numbers<[1], [0], [0], [1], [0, 0, 1, 1], [], []>} : vector<8x8xf32>, vector<8x128xf32>, vector<8x128xf32> -> vector<8x128xf32>
    %127 = tpu.iota {dimensions = array<i32: 1>} : vector<8x128xi32>
    %c4_i32 = arith.constant 4 : i32
    %128 = vector.broadcast %c4_i32 : i32 to vector<8x128xi32>
    %129 = arith.cmpi slt, %127, %128 : vector<8x128xi32>
    %cst_43 = arith.constant -1.000000e+30 : f32
    %130 = vector.broadcast %cst_43 : f32 to vector<8x128xf32>
    %131 = arith.select %129, %126, %130 : vector<8x128xi1>, vector<8x128xf32>
    %cst_44 = arith.constant dense<0xFF800000> : vector<8xf32>
    %132 = vector.multi_reduction <maximumf>, %131, %cst_44 [1] : vector<8x128xf32> to vector<8xf32>
    %133 = vector.shape_cast %132 : vector<8xf32> to vector<8x1xf32>
    %134 = vector.broadcast %133 : vector<8x1xf32> to vector<8x128xf32>
    %135 = arith.subf %126, %134 : vector<8x128xf32>
    %136 = math.exp %135 : vector<8x128xf32>
    %cst_45 = arith.constant 0.000000e+00 : f32
    %137 = vector.broadcast %cst_45 : f32 to vector<8x128xf32>
    %138 = arith.select %129, %136, %137 : vector<8x128xi1>, vector<8x128xf32>
    %cst_46 = arith.constant dense<0.000000e+00> : vector<8xf32>
    %139 = vector.multi_reduction <add>, %138, %cst_46 [1] : vector<8x128xf32> to vector<8xf32>
    %140 = vector.shape_cast %139 : vector<8xf32> to vector<8x1xf32>
    %141 = vector.broadcast %140 : vector<8x1xf32> to vector<8x128xf32>
    %142 = arith.divf %138, %141 : vector<8x128xf32>
    %c0_47 = arith.constant 0 : index
    %c0_48 = arith.constant 0 : index
    %c0_49 = arith.constant 0 : index
    %143 = vector.load %arg4[%c0_47, %c0_48, %c0_49] : memref<1x8x128xf32, #tpu.memory_space<vmem>>, vector<1x8x128xf32>
    %144 = vector.shape_cast %143 : vector<1x8x128xf32> to vector<8x128xf32>
    %145 = vector.shape_cast %142 : vector<8x128xf32> to vector<1x8x128xf32>
    tpu.vector_store %arg4[%c0_47, %c0_48, %c0_49], %145 {strides = array<i32>} : memref<1x8x128xf32, #tpu.memory_space<vmem>>, vector<1x8x128xf32>,
    return
  }
  func.func @transform_0(%arg0: i32) -> (i32, i32) {
    %c0_i32 = arith.constant 0 : i32
    %c0_i32_0 = arith.constant 0 : i32
    %c0_i32_1 = arith.constant 0 : i32
    return %c0_i32, %c0_i32_0 : i32, i32
  }
  func.func @transform_1(%arg0: i32) -> (i32, i32, i32) {
    %c0_i32 = arith.constant 0 : i32
    %c0_i32_0 = arith.constant 0 : i32
    %c0_i32_1 = arith.constant 0 : i32
    return %arg0, %c0_i32, %c0_i32_0 : i32, i32, i32
  }
  func.func @transform_2(%arg0: i32) -> (i32, i32, i32) {
    %c0_i32 = arith.constant 0 : i32
    %c0_i32_0 = arith.constant 0 : i32
    %c0_i32_1 = arith.constant 0 : i32
    return %arg0, %c0_i32, %c0_i32_0 : i32, i32, i32
  }
  func.func @transform_3(%arg0: i32) -> (i32, i32, i32) {
    %c0_i32 = arith.constant 0 : i32
    %c0_i32_0 = arith.constant 0 : i32
    %c0_i32_1 = arith.constant 0 : i32
    return %arg0, %c0_i32, %c0_i32_0 : i32, i32, i32
  }
}

</mosaic_0001>

<bundles_post_ra>
// kernel: downprompt_forward.1
= control target key start
LH: loop header
LB: loop body
LE: loop exit
PB: predicated region body
PF: predicated region fallthrough
CT: control target
= control target key end

     0   :  { %9 = vsyncpa [#allocation3], 0  ;;  %s1822_s0 = inlined_call_operand.hbm [shape: f32[112,128], index: 0, kind: input, shape index: {}]   ;;  %s1823_s1 = inlined_call_operand.hbm [shape: s32[4,1,136], index: 1, kind: input, shape index: {}]   ;;  %s1824_s2 = inlined_call_operand.hbm [shape: f32[4,8,128], index: 2, kind: output, shape index: {0}]   ;;  %s1825_s3 = inlined_call_operand.vmem [shape: f32[4,8,128], index: 3, kind: output, shape index: {1}]  }
   0x1   :  { %10 = vsyncpa [#allocation6], 0 }
   0x2   :  { %12 = vsyncpa [#allocation6 + $0x1], 0 }
   0x3   :  { %13 = vsyncpa [#allocation4], 0 }
   0x4   :  { %15 = vsyncpa [#allocation4 + $0x1], 0  ;;  %s1391_s12 = smov 0   ;;  %s1393_s13 = smov 0  }
   0x5   :  { %s1395_s14 = smov 0   ;;  %s1397_s15 = smov 0  }
   0x6 LB: > { %s136_s18 = sshll.u32 %s1822_s0, 4  ;;  %s1415_s19 = sadd.s32 4294967295, %s1364_s15   ;;  %s1364_s15 = sphi %s1397_s15, %s1866_s15   ;;  %s1360_s14 = sphi %s1395_s14, %s1865_s14   ;;  %s1356_s13 = sphi %s1393_s13, %s1864_s13   ;;  %s1352_s12 = sphi %s1391_s12, %s1863_s12   ;;  %s137_s18 = int_to_ptr.hbm [resolvable:$true] %s136_s18 }
   0x7   : > { %p1032_p0 = scmp.ge.s32.totalorder %s1364_s15, 1  ;;  %p63_p1 = scmp.eq.s32.totalorder %s1415_s19, 0 }
   0x8   : > { %p125_p2 = scmp.lt.s32.totalorder %s1364_s15, 5  ;;  %s1366_s21 = smov [#allocation2]  }
   0x9   : > { %s138_s22 = sshll.u32 %s1366_s21, 4  ;;  %s1367_s23 = smov 128   ;;  %s139_s22 = int_to_ptr.vmem [resolvable:$true] %s138_s22 }
   0xa   : > { %p1420_p3 = pnand %p1032_p0, %p125_p2  ;;  %s1368_s24 = smov 8  }
   0xb   : > { %s1031_s25 = sadd.s32 4294967294, %s1364_s15   ;;  %s1430_s26 = sadd.s32 1, %s1364_s15  }
   0xc   : > { %p1160_p4 = pneg %p1420_p3  ;;  %s49_s27 = sadd.s32 1, %s1360_s14 }
   0xd   : > { %s46_s28 = ssub.s32 %s1364_s15, %s1430_s26  ;;  %p56_p6 = scmp.ne.s32.totalorder %s1360_s14, %s1356_s13 }
   0xe   : > { %p1161_p5 = pnand %p1160_p4, %p63_p1  ;;  %p47_p7 = scmp.eq.s32.totalorder %s46_s28, 0 }
   0xf   : > { %p57_p8 = scmp.eq.s32.totalorder %s1364_s15, 0  ;;  %p62_p9 = scmp.ne.s32.totalorder %s1356_s13, %s1352_s12 }
  0x10   : > { %1163 = dma.hbm_to_vmem [thread:$0]  (!%p1161_p5), %s137_s18, 1792, %s139_s22, [#allocation3], %s1367_s23, %s1367_s23, %s1368_s24  }
  0x11   : > { %p86_p10 = scmp.eq.s32.totalorder %s1415_s19, 3  ;;  %p1446_p11 = por %p63_p1, %p62_p9 }
  0x12   : > { %s1442_s29 = scalar_select %p47_p7, %s1360_s14, %s49_s27  }
  0x13   : > { %p1450_p12 = por %p86_p10, %p56_p6  ;;  %p92_p13 = scmp.eq.s32.totalorder %s1031_s25, 3 }
  0x14   : > { %p58_p0 = por %p57_p8, %p56_p6  ;;  %s152_s5 = sand.u32 1, %s1360_s14  }
  0x15   : > { %p1455_p2 = por %p92_p13, %p62_p9  ;;  %p1173_p4 = scmp.lt.s32.totalorder %s1364_s15, 4 }
  0x16   : > { %s1035_s7 = sshll.u32 %s152_s5, 1  ;;  %s1036_s8 = sshll.u32 %s1364_s15, 1 }
  0x17   : > { %s160_s11 = scalar_lea.hbm %s1823_s1, %s1036_s8  ;;  %s156_s17 = scalar_lea.vmem [#allocation5], %s1035_s7 }
  0x18   : > { %s162_s16 = sshll.u32 %s160_s11, 4  ;;  %s164_s18 = sshll.u32 %s156_s17, 4  ;;  %s163_s16 = int_to_ptr.hbm [resolvable:$true] %s162_s16  ;;  %s165_s18 = int_to_ptr.vmem [resolvable:$true] %s164_s18 }
  0x19   : > { %p1464_p5 = pnand %p1173_p4, %p58_p0  ;;  %s153_s22 = scalar_lea.sflag [#allocation6], %s152_s5 }
  0x1a   : > { %s1264_s23 = sshra.s32 %s163_s16, 4  ;;  %s1271_s28 = scalar_lea.hbm %s1823_s1, 8  ;;  %s1265_s23 = int_to_ptr.hbm [resolvable:$true] %s1264_s23 }
  0x1b   : > { %s1266_s24 = scalar_lea.hbm %s1265_s23, 2  ;;  %p1268_p7 = pneg %p1464_p5 }
  0x1c   : > { %p1267_p6 = scmp.ne.s32.totalorder %s1265_s23, %s1266_s24  ;;  %p1272_p10 = scmp.lt.s32.totalorder %s1265_s23, %s1823_s1 }
  0x1d   : > { %p1273_p13 = scmp.lt.s32.totalorder %s1271_s28, %s1266_s24 }
  0x1e   : > { %p1269_p8 = pnand %p1268_p7, %p1267_p6 }
  0x1f   : > { %p1274_p0 = por %p1273_p13, %p1272_p10 }
  0x20   : > { %p1270_p9 = pneg %p1269_p8 }
  0x22   : > { %p1275_p4 = pnand %p1274_p0, %p1270_p9 }
  0x24   : > { %1278 = shalt.err (!%p1275_p4)
}
  0x25   : > { %1167 = dma.hbm_to_vmem [thread:$0]  (!%p1464_p5), %s163_s16, 32, %s165_s18, %s153_s22  }
  0x26   : > { %173 = sbr.rel (%p1420_p3) target bundleno = 2163 (0x873), region = 28 }
  0x2b   : > { %1339 = dma.done.wait (%p63_p1), [#allocation3], 1792  }
  0x2c   : > { %1341 = vsyncadd (%p63_p1), [#allocation3], 4294965504  ;;  %s1485_s5 = sand.u32 1, %s1356_s13  }
  0x2d   : > { %s1039_s9 = sshll.u32 %s1485_s5, 1  ;;  %s181_s10 = scalar_lea.sflag [#allocation6], %s1485_s5 }
  0x2e   : > { %s184_s11 = scalar_lea.vmem [#allocation5], %s1039_s9 }
  0x2f   : > { %1343 = dma.done.wait (%p1446_p11), %s181_s10, 32  }
  0x30   : > { %1345 = vsyncadd (%p1446_p11), %s181_s10, 4294967264  ;;  %v229_v0 = vlaneseq  ;;  %v228_v2 = vld [vmem:[%s184_s11] sm:$0x3]  ;;  %v219_v3 = vld [vmem:[#allocation2 + $0x18] sm:$0xff]  ;;  %v1369_v9 = vmov 0.0   ;;  %s1040_s20 = sshll.u32 %s1485_s5, 3 }
  0x31   : > { %v218_v4 = vld [vmem:[#allocation2 + $0x10] sm:$0xff]  ;;  %v234_v5 = vperm.slane %v228_v2, 0  ;;  %v235_v6 = vperm.slane %v228_v2, 1  ;;  %vm223_vm0 = vcmp.ne.f32.partialorder %v219_v3, %v219_v3  ;;  %v217_v7 = vld [vmem:[#allocation2 + $0x8] sm:$0xff]  ;;  %v216_v20 = vld [vmem:[#allocation2] sm:$0xff]  ;;  %s1775_s30 = scalar_lea.vmem [#allocation7], %s1040_s20 }
  0x32   : > { %v1494_v1 = vshrl.u32 %v229_v0, 7  ;;  %vm222_vm1 = vcmp.ne.f32.partialorder %v218_v4, %v218_v4  ;;  %vm1050_vm2 = vmneg %vm223_vm0  ;;  %vm221_vm3 = vcmp.ne.f32.partialorder %v217_v7, %v217_v7  ;;  %vm220_vm14 = vcmp.ne.f32.partialorder %v216_v20, %v216_v20  ;;  %v1213_v37 = vld [vmem:[#allocation2 + $0x20] ss:$0 sm:$0xff]  ;;  %v1215_v55 = vld [vmem:[#allocation2 + $0x22] ss:$0 sm:$0xff]  ;;  %s1145_s16 = sshll.u32 %s1415_s19, 3 }
  0x33   : > { %1051 = vmatpush.msk.msra.mxu0 %vm1050_vm2, %v219_v3  ;;  %vm1052_vm5 = vmneg %vm222_vm1  ;;  %1148 = vmatpush.msk.msra.mxu1 %vm1050_vm2, %v219_v3  ;;  %vm1826_vm0 = vcmask 261120   ;;  %s917_s21 = scalar_lea.hbm %s1824_s2, %s1145_s16  ;;  %s919_s22 = sshll.u32 %s1775_s30, 4  ;;  %s920_s22 = int_to_ptr.vmem [resolvable:$true] %s919_s22 }
  0x34   : > { %vm236_vm4 = vcmp.eq.s32.totalorder %v1494_v1, %v234_v5  ;;  %v231_v8 = vadd.s32 8, %v1494_v1  ;;  %vm237_vm6 = vcmp.eq.s32.totalorder %v1494_v1, %v235_v6  ;;  %vm1054_vm7 = vmneg %vm221_vm3  ;;  %v232_v13 = vadd.s32 16, %v1494_v1  ;;  %s921_s23 = sshll.u32 %s917_s21, 4  ;;  %s903_s24 = scalar_lea.sflag [#allocation4], %s1485_s5  ;;  %s922_s23 = int_to_ptr.hbm [resolvable:$true] %s921_s23 }
  0x35   : > { %v1042_v10 = vsel %vm236_vm4, 1.0, %v1369_v9  ;;  %v1043_v11 = vsel %vm237_vm6, 1.0, %v1369_v9  ;;  %1053 = vmatpush.msk.msra.mxu0 %vm1052_vm5, %v218_v4  ;;  %1149 = vmatpush.msk.msra.mxu1 %vm1052_vm5, %v218_v4  ;;  %v233_v16 = vadd.s32 24, %v1494_v1  ;;  %vm1056_vm15 = vmneg %vm220_vm14  ;;  %s1308_s25 = sshra.s32 %s922_s23, 4  ;;  %s1314_s8 = scalar_lea.hbm %s1824_s2, 32  ;;  %s1309_s25 = int_to_ptr.hbm [resolvable:$true] %s1308_s25 }
  0x36   : > { %260 = vxpose.xlu0.b32.start [1/4] (short) %v1042_v10, 128  ;;  %vm238_vm8 = vcmp.eq.s32.totalorder %v231_v8, %v234_v5  ;;  %292 = vxpose.xlu1.b32.start [1/4] (short) (narrow) %v1043_v11, 8  ;;  %vm239_vm9 = vcmp.eq.s32.totalorder %v231_v8, %v235_v6  ;;  %vm240_vm10 = vcmp.eq.s32.totalorder %v232_v13, %v234_v5  ;;  %v1214_v10 = vld [vmem:[#allocation2 + $0x21] ss:$0 sm:$0xff]  ;;  %v1370_v8 = vmov 1.0   ;;  %s1310_s27 = scalar_lea.hbm %s1309_s25, 8  ;;  %p1315_p5 = scmp.lt.s32.totalorder %s1309_s25, %s1824_s2 }
  0x37   : > { %1055 = vmatpush.msk.msra.mxu0 %vm1054_vm7, %v217_v7  ;;  %1150 = vmatpush.msk.msra.mxu1 %vm1054_vm7, %v217_v7  ;;  %v1044_v12 = vsel %vm238_vm8, 1.0, %v1369_v9  ;;  %v1045_v14 = vsel %vm239_vm9, 1.0, %v1369_v9  ;;  %vm241_vm11 = vcmp.eq.s32.totalorder %v232_v13, %v235_v6  ;;  %v1046_v15 = vsel %vm240_vm10, 1.0, %v1369_v9  ;;  %p1311_p1 = scmp.ne.s32.totalorder %s1309_s25, %s1310_s27  ;;  %p1316_p6 = scmp.lt.s32.totalorder %s1314_s8, %s1310_s27 }
  0x38   : > { %v1047_v17 = vsel %vm241_vm11, 1.0, %v1369_v9  ;;  %vm242_vm12 = vcmp.eq.s32.totalorder %v233_v16, %v234_v5  ;;  %vm243_vm13 = vcmp.eq.s32.totalorder %v233_v16, %v235_v6 }
  0x39   : > { %v1048_v18 = vsel %vm242_vm12, 1.0, %v1369_v9  ;;  %v1049_v19 = vsel %vm243_vm13, 1.0, %v1369_v9  ;;  %1057 = vmatpush.msk.msra.mxu0 %vm1056_vm15, %v216_v20  ;;  %1151 = vmatpush.msk.msra.mxu1 %vm1056_vm15, %v216_v20  ;;  %p1312_p3 = pnand %p1311_p1, %p1450_p12  ;;  %p1317_p7 = por %p1316_p6, %p1315_p5 }
  0x3b   : > { %p1313_p11 = pneg %p1312_p3 }
  0x3d   : > { %p1318_p8 = pnand %p1317_p7, %p1313_p11 }
  0x3e   : > { %261 = vxpose.xlu0.b32.cont [2/4] (short) %v1044_v12, 128  ;;  %293 = vxpose.xlu1.b32.cont [2/4] (short) (narrow) %v1045_v14, 8 }
  0x46   : > { %262 = vxpose.xlu0.b32.cont [3/4] (short) %v1046_v15, 128  ;;  %294 = vxpose.xlu1.b32.cont [3/4] (short) (narrow) %v1047_v17, 8  ;;  %v1759_v15 = vand.u32 127, %v229_v0 }
  0x4e   : > { %263 = vxpose.xlu0.b32.end [4/4] (short) %v1048_v18, 128  ;;  %295 = vxpose.xlu1.b32.end [4/4] (short) (narrow) %v1049_v19, 8 }
  0xda   : > { %v276_v21 = vpop.trf.xlu0  ;;  %v308_v39 = vpop.trf.xlu1 }
  0xdb   : > { %1058 = vmatmul.msk.f32.vlgmr.msra.gmra.mxu0 %vm1826_vm0, %v276_v21 }
  0xe2   : > { %v277_v22 = vpop.trf.xlu0 }
  0xe3   : > { %1059 = vmatmul.msk.f32.gmra.mxu0 %vm1826_vm0, %v277_v22 }
  0xea   : > { %v278_v23 = vpop.trf.xlu0 }
  0xeb   : > { %1060 = vmatmul.msk.f32.gmra.mxu0 %vm1826_vm0, %v278_v23 }
  0xf2   : > { %v279_v24 = vpop.trf.xlu0 }
  0xf3   : > { %1061 = vmatmul.msk.f32.gmra.mxu0 %vm1826_vm0, %v279_v24 }
  0xfa   : > { %v280_v25 = vpop.trf.xlu0 }
  0xfb   : > { %1062 = vmatmul.msk.f32.gmra.mxu0 %vm1826_vm0, %v280_v25 }
 0x102   : > { %v281_v26 = vpop.trf.xlu0 }
 0x103   : > { %1063 = vmatmul.msk.f32.gmra.mxu0 %vm1826_vm0, %v281_v26 }
 0x10a   : > { %v282_v27 = vpop.trf.xlu0 }
 0x10b   : > { %1064 = vmatmul.msk.f32.gmra.mxu0 %vm1826_vm0, %v282_v27 }
 0x112   : > { %v283_v28 = vpop.trf.xlu0 }
 0x113   : > { %1065 = vmatmul.msk.f32.gmra.mxu0 %vm1826_vm0, %v283_v28 }
 0x11a   : > { %v284_v29 = vpop.trf.xlu0 }
 0x11b   : > { %1066 = vmatmul.msk.f32.gmra.mxu0 %vm1826_vm0, %v284_v29 }
 0x122   : > { %v285_v30 = vpop.trf.xlu0 }
 0x123   : > { %1067 = vmatmul.msk.f32.gmra.mxu0 %vm1826_vm0, %v285_v30 }
 0x12a   : > { %v286_v31 = vpop.trf.xlu0 }
 0x12b   : > { %1068 = vmatmul.msk.f32.vlgmr.msra.gmra.mxu1 %vm1826_vm0, %v286_v31 }
 0x132   : > { %v287_v32 = vpop.trf.xlu0 }
 0x133   : > { %1069 = vmatmul.msk.f32.gmra.mxu1 %vm1826_vm0, %v287_v32 }
 0x13a   : > { %v288_v33 = vpop.trf.xlu0 }
 0x13b   : > { %1070 = vmatmul.msk.f32.gmra.mxu1 %vm1826_vm0, %v288_v33  ;;  %v718_v33 = vld [vmem:[#allocation2 + $0x58] sm:$0xff] }
 0x142   : > { %v289_v34 = vpop.trf.xlu0 }
 0x143   : > { %1071 = vmatmul.msk.f32.gmra.mxu1 %vm1826_vm0, %v289_v34 }
 0x14a   : > { %v290_v35 = vpop.trf.xlu0 }
 0x14b   : > { %1072 = vmatmul.msk.f32.gmra.mxu1 %vm1826_vm0, %v290_v35 }
 0x152   : > { %v291_v36 = vpop.trf.xlu0 }
 0x153   : > { %1073 = vmatmul.msk.f32.gmra.mxu1 %vm1826_vm0, %v291_v36 }
 0x158   : > { %v393_v38 = vpop.f32.mrf.mxu0 }
 0x159   : > { %v1517_v40 = vmul.f32 %v1213_v37, %v393_v38 }
 0x15b   : > { %1074 = vmatmul.msk.f32.gmra.mxu1 %vm1826_vm0, %v308_v39  ;;  %v575_v41 = vmul.f32 %v1517_v40, %v1517_v40 }
 0x15d   : > { %576 = vadd.xlane.f32.xlu2 %v575_v41 }
 0x160   : > { %v1522_v42 = vpop.f32.mrf.mxu0 }
 0x161   : > { %v1648_v35 = vmul.f32 %v1214_v10, %v1522_v42 }
 0x168   : > { %v1524_v43 = vpop.f32.mrf.mxu0 }
 0x169   : > { %v1630_v31 = vmul.f32 %v1214_v10, %v1524_v43 }
 0x170   : > { %v1526_v44 = vpop.f32.mrf.mxu0 }
 0x171   : > { %v529_v29 = vmul.f32 %v1214_v10, %v1526_v44 }
 0x178   : > { %v1528_v46 = vpop.f32.mrf.mxu0 }
 0x179   : > { %v1599_v25 = vmul.f32 %v1214_v10, %v1528_v46 }
 0x180   : > { %v1530_v48 = vpop.f32.mrf.mxu0 }
 0x181   : > { %v1584_v23 = vmul.f32 %v1214_v10, %v1530_v48 }
 0x188   : > { %v411_v51 = vpop.f32.mrf.mxu0 }
 0x189   : > { %v1567_v19 = vmul.f32 %v1214_v10, %v411_v51 }
 0x190   : > { %v414_v53 = vpop.f32.mrf.mxu0 }
 0x191   : > { %v1556_v17 = vmul.f32 %v1214_v10, %v414_v53 }
 0x198   : > { %v417_v56 = vpop.f32.mrf.mxu0 }
 0x199   : > { %v1546_v13 = vmul.f32 %v1214_v10, %v417_v56 }
 0x1a0   : > { %v420_v5 = vpop.f32.mrf.mxu0 }
 0x1a1   : > { %v1537_v11 = vmul.f32 %v1215_v55, %v420_v5 }
 0x1a3   : > { %vm551_vm14 = vcmp.ne.f32.partialorder %v1537_v11, %v1537_v11 }
 0x1a4   : > { %v567_v42 = vsel %vm551_vm14, 0.0, %v1537_v11 }
 0x1a5   : > { %v597_v44 = vmul.f32 %v567_v42, %v567_v42 }
 0x1a8   : > { %v423_v45 = vpop.f32.mrf.mxu1 }
 0x1a9   : > { %v536_v6 = vmul.f32 %v1215_v55, %v423_v45 }
 0x1ab   : > { %vm552_vm12 = vcmp.ne.f32.partialorder %v536_v6, %v536_v6 }
 0x1ac   : > { %vm1563_vm15 = vmneg %vm552_vm12  ;;  %v568_v34 = vsel %vm552_vm12, 0.0, %v536_v6  ;;  %vm544_vm12 = vcmp.ne.f32.partialorder %v1630_v31, %v1630_v31 }
 0x1ad   : > { %v598_v38 = vmul.f32 %v568_v34, %v568_v34  ;;  %v717_v34 = vld [vmem:[#allocation2 + $0x50] sm:$0xff] }
 0x1b0   : > { %v426_v47 = vpop.f32.mrf.mxu1 }
 0x1b1   : > { %v537_v4 = vmul.f32 %v1215_v55, %v426_v47 }
 0x1b3   : > { %vm553_vm10 = vcmp.ne.f32.partialorder %v537_v4, %v537_v4 }
 0x1b4   : > { %vm1551_vm13 = vmneg %vm553_vm10  ;;  %v569_v28 = vsel %vm553_vm10, 0.0, %v537_v4 }
 0x1b5   : > { %v599_v32 = vmul.f32 %v569_v28, %v569_v28 }
 0x1b8   : > { %v429_v49 = vpop.f32.mrf.mxu1 }
 0x1b9   : > { %v538_v63 = vmul.f32 %v1215_v55, %v429_v49 }
 0x1bb   : > { %vm554_vm8 = vcmp.ne.f32.partialorder %v538_v63, %v538_v63 }
 0x1bc   : > { %vm1542_vm11 = vmneg %vm554_vm8  ;;  %v570_v22 = vsel %vm554_vm8, 0.0, %v538_v63 }
 0x1bd   : > { %v600_v26 = vmul.f32 %v570_v22, %v570_v22 }
 0x1c0   : > { %v432_v50 = vpop.f32.mrf.mxu1 }
 0x1c1   : > { %v539_v61 = vmul.f32 %v1215_v55, %v432_v50 }
 0x1c3   : > { %vm555_vm6 = vcmp.ne.f32.partialorder %v539_v61, %v539_v61 }
 0x1c4   : > { %vm1533_vm9 = vmneg %vm555_vm6  ;;  %v571_v16 = vsel %vm555_vm6, 0.0, %v539_v61 }
 0x1c5   : > { %v601_v20 = vmul.f32 %v571_v16, %v571_v16 }
 0x1c8   : > { %v435_v52 = vpop.f32.mrf.mxu1 }
 0x1c9   : > { %v540_v59 = vmul.f32 %v1215_v55, %v435_v52 }
 0x1cb   : > { %vm556_vm4 = vcmp.ne.f32.partialorder %v540_v59, %v540_v59 }
 0x1cc   : > { %vm1079_vm7 = vmneg %vm556_vm4  ;;  %v572_v9 = vsel %vm556_vm4, 0.0, %v540_v59 }
 0x1cd   : > { %v602_v14 = vmul.f32 %v572_v9, %v572_v9 }
 0x1d0   : > { %v438_v54 = vpop.f32.mrf.mxu1  ;;  %v577_v36 = vpop.xlane.xlu2 %576 }
 0x1d1   : > { %v541_v57 = vmul.f32 %v1215_v55, %v438_v54  ;;  %v578_v39 = vmax.f32 %v577_v36, 1e-16 }
 0x1d3   : > { %vm557_vm2 = vcmp.ne.f32.partialorder %v541_v57, %v541_v57  ;;  %1218 = vrsqrt.f32 %v578_v39 }
 0x1d4   : > { %vm1077_vm5 = vmneg %vm557_vm2  ;;  %v573_v3 = vsel %vm557_vm2, 0.0, %v541_v57 }
 0x1d5   : > { %v603_v7 = vmul.f32 %v573_v3, %v573_v3  ;;  %vm1578_vm2 = vmneg %vm551_vm14 }
 0x1d8   : > { %v441_v58 = vpop.f32.mrf.mxu1 }
 0x1d9   : > { %v542_v60 = vmul.f32 %v1215_v55, %v441_v58  ;;  %v1219_v49 = vpop.eup %1218 }
 0x1da   : > { %v580_v52 = vmul.f32 %v1219_v49, %v578_v39 }
 0x1db   : > { %vm558_vm1 = vcmp.ne.f32.partialorder %v542_v60, %v542_v60 }
 0x1dc   : > { %vm1075_vm3 = vmneg %vm558_vm1  ;;  %v574_v62 = vsel %vm558_vm1, 0.0, %v542_v60  ;;  %vm550_vm1 = vcmp.ne.f32.partialorder %v1546_v13, %v1546_v13  ;;  %v581_v55 = vmul.f32 %v1219_v49, %v580_v52  ;;  %v723_v52 = vld [vmem:[#allocation2 + $0x38] sm:$0xff] }
 0x1dd   : > { %1076 = vmatpush.xpose.msk.msra.mxu2 %vm1075_vm3, %v542_v60  ;;  %1108 = vmatpush.msk.msra.mxu3 %vm1075_vm3, %v542_v60  ;;  %v604_v2 = vmul.f32 %v574_v62, %v574_v62  ;;  %vm549_vm3 = vcmp.ne.f32.partialorder %v1556_v17, %v1556_v17  ;;  %vm1594_vm4 = vmneg %vm550_vm1  ;;  %v566_v46 = vsel %vm550_vm1, 0.0, %v1546_v13  ;;  %vm1859_vm1 = vcmp.ne.f32.partialorder %v1599_v25, %v1599_v25 }
 0x1de   : > { %vm1611_vm6 = vmneg %vm549_vm3  ;;  %v596_v47 = vmul.f32 %v566_v46, %v566_v46  ;;  %v565_v48 = vsel %vm549_vm3, 0.0, %v1556_v17  ;;  %v582_v58 = vmul.f32 0.5, %v581_v55  ;;  %vm585_vm3 = vweird.f32 %v578_v39  ;;  %v1216_v55 = vld [vmem:[#allocation2 + $0x24] ss:$0 sm:$0xff] }
 0x1df   : > { %605 = vmatpush.xpose.msrb.mxu1 %v604_v2  ;;  %1110 = vmatpush.msk.msra.mxu3 %vm1077_vm5, %v541_v57  ;;  %v595_v50 = vmul.f32 %v565_v48, %v565_v48  ;;  %v716_v48 = vld [vmem:[#allocation2 + $0x48] sm:$0xff] }
 0x1e1   : > { %1078 = vmatpush.xpose.msk.msra.mxu2 %vm1077_vm5, %v541_v57  ;;  %1112 = vmatpush.msk.msra.mxu3 %vm1079_vm7, %v540_v59  ;;  %vm548_vm5 = vcmp.ne.f32.partialorder %v1567_v19, %v1567_v19  ;;  %v562_v57 = vsel %vm1859_vm1, 0.0, %v1599_v25 }
 0x1e2   : > { %vm1625_vm8 = vmneg %vm548_vm5  ;;  %v564_v51 = vsel %vm548_vm5, 0.0, %v1567_v19 }
 0x1e3   : > { %606 = vmatpush.xpose.msrb.mxu1 %v603_v7  ;;  %1114 = vmatpush.msk.msra.mxu3 %vm1533_vm9, %v539_v61  ;;  %v594_v53 = vmul.f32 %v564_v51, %v564_v51 }
 0x1e5   : > { %1080 = vmatpush.xpose.msk.msra.mxu2 %vm1079_vm7, %v540_v59  ;;  %1116 = vmatpush.msk.msra.mxu3 %vm1542_vm11, %v538_v63  ;;  %vm547_vm7 = vcmp.ne.f32.partialorder %v1584_v23, %v1584_v23  ;;  %v592_v59 = vmul.f32 %v562_v57, %v562_v57 }
 0x1e6   : > { %vm1642_vm10 = vmneg %vm547_vm7  ;;  %v563_v54 = vsel %vm547_vm7, 0.0, %v1584_v23 }
 0x1e7   : > { %607 = vmatpush.xpose.msrb.mxu1 %v602_v14  ;;  %1118 = vmatpush.msk.msra.mxu3 %vm1551_vm13, %v537_v4  ;;  %v593_v56 = vmul.f32 %v563_v54, %v563_v54  ;;  %v721_v54 = vld [vmem:[#allocation2 + $0x28] sm:$0xff] }
 0x1e9   : > { %1082 = vmatpush.xpose.msk.msra.mxu2 %vm1533_vm9, %v539_v61  ;;  %1120 = vmatpush.msk.msra.mxu3 %vm1563_vm15, %v536_v6  ;;  %vm1827_vm9 = vcmp.ne.f32.partialorder %v1599_v25, %v1599_v25  ;;  %v583_v61 = vsub.f32 1.5, %v582_v58 }
 0x1eb   : > { %608 = vmatpush.xpose.msrb.mxu1 %v601_v20  ;;  %1122 = vmatpush.msk.msra.mxu3 %vm1578_vm2, %v1537_v11  ;;  %v584_v2 = vmul.f32 %v1219_v49, %v583_v61 }
 0x1ed   : > { %1084 = vmatpush.xpose.msk.msra.mxu2 %vm1542_vm11, %v538_v63  ;;  %1124 = vmatpush.msk.msra.mxu3 %vm1594_vm4, %v1546_v13  ;;  %vm545_vm11 = vcmp.ne.f32.partialorder %v529_v29, %v529_v29  ;;  %v560_v63 = vsel %vm544_vm12, 0.0, %v1630_v31 }
 0x1ee   : > { %vm1668_vm0 = vmneg %vm545_vm11  ;;  %v561_v60 = vsel %vm545_vm11, 0.0, %v529_v29  ;;  %v590_v3 = vmul.f32 %v560_v63, %v560_v63  ;;  %v774_v63 = vld [vmem:[#allocation2 + $0x68] sm:$0xff] }
 0x1ef   : > { %609 = vmatpush.xpose.msrb.mxu1 %v600_v26  ;;  %1126 = vmatpush.msk.msra.mxu3 %vm1611_vm6, %v1556_v17  ;;  %v591_v62 = vmul.f32 %v561_v60, %v561_v60 }
 0x1f1   : > { %1086 = vmatpush.xpose.msk.msra.mxu2 %vm1551_vm13, %v537_v4  ;;  %1128 = vmatpush.msk.msra.mxu3 %vm1625_vm8, %v1567_v19  ;;  %vm1656_vm13 = vmneg %vm1827_vm9 }
 0x1f2   : > { %vm1683_vm9 = vmneg %vm544_vm12 }
 0x1f3   : > { %610 = vmatpush.xpose.msrb.mxu1 %v599_v32  ;;  %1130 = vmatpush.msk.msra.mxu3 %vm1642_vm10, %v1584_v23  ;;  %v719_v32 = vld [vmem:[#allocation2 + $0x60] sm:$0xff] }
 0x1f5   : > { %1088 = vmatpush.xpose.msk.msra.mxu2 %vm1563_vm15, %v536_v6  ;;  %1132 = vmatpush.msk.msra.mxu3 %vm1656_vm13, %v1599_v25  ;;  %vm543_vm15 = vcmp.ne.f32.partialorder %v1648_v35, %v1648_v35 }
 0x1f6   : > { %vm1696_vm14 = vmneg %vm543_vm15  ;;  %v559_v4 = vsel %vm543_vm15, 0.0, %v1648_v35 }
 0x1f7   : > { %611 = vmatpush.xpose.msrb.mxu1 %v598_v38  ;;  %1134 = vmatpush.msk.msra.mxu3 %vm1668_vm0, %v529_v29  ;;  %v589_v6 = vmul.f32 %v559_v4, %v559_v4 }
 0x1f9   : > { %1090 = vmatpush.xpose.msk.msra.mxu2 %vm1578_vm2, %v1537_v11  ;;  %1136 = vmatpush.msk.msra.mxu3 %vm1683_vm9, %v1630_v31  ;;  %vm586_vm2 = vweird.f32 %v1219_v49  ;;  %v661_v11 = vmul.u32 8, %v1494_v1 }
 0x1fb   : > { %612 = vmatpush.xpose.msrb.mxu1 %v597_v44  ;;  %1138 = vmatpush.msk.msra.mxu3 %vm1696_vm14, %v1648_v35  ;;  %v662_v12 = vadd.s32 64, %v661_v11  ;;  %v664_v16 = vadd.s32 8, %v661_v11 }
 0x1fd   : > { %1092 = vmatpush.xpose.msk.msra.mxu2 %vm1594_vm4, %v1546_v13  ;;  %vm663_vm4 = vcmp.ge.s32.totalorder %v1759_v15, %v661_v11  ;;  %vm665_vm5 = vcmp.lt.s32.totalorder %v1759_v15, %v664_v16  ;;  %739 = vmatpush.xpose.msrb.mxu3 %v719_v32 }
 0x1ff   : > { %613 = vmatpush.xpose.msrb.mxu1 %v596_v47 }
 0x201   : > { %1094 = vmatpush.xpose.msk.msra.mxu2 %vm1611_vm6, %v1556_v17  ;;  %v668_v17 = vadd.s32 8, %v662_v12  ;;  %vm667_vm6 = vcmp.ge.s32.totalorder %v1759_v15, %v662_v12  ;;  %740 = vmatpush.xpose.msrb.mxu3 %v718_v33 }
 0x203   : > { %614 = vmatpush.xpose.msrb.mxu1 %v595_v50  ;;  %vm669_vm7 = vcmp.lt.s32.totalorder %v1759_v15, %v668_v17 }
 0x204   : > { %vm670_vm11 = vmand %vm667_vm6, %vm669_vm7 }
 0x205   : > { %1096 = vmatpush.xpose.msk.msra.mxu2 %vm1625_vm8, %v1567_v19  ;;  %741 = vmatpush.xpose.msrb.mxu3 %v717_v34 }
 0x207   : > { %615 = vmatpush.xpose.msrb.mxu1 %v594_v53  ;;  %v722_v53 = vld [vmem:[#allocation2 + $0x30] sm:$0xff] }
 0x209   : > { %1098 = vmatpush.xpose.msk.msra.mxu2 %vm1642_vm10, %v1584_v23  ;;  %742 = vmatpush.xpose.msrb.mxu3 %v716_v48 }
 0x20b   : > { %616 = vmatpush.xpose.msrb.mxu1 %v593_v56 }
 0x20d   : > { %1100 = vmatpush.xpose.msk.msra.mxu2 %vm1656_vm13, %v1599_v25 }
 0x20f   : > { %617 = vmatpush.xpose.msrb.mxu1 %v592_v59  ;;  %v1217_v59 = vld [vmem:[#allocation2 + $0x23] ss:$0 sm:$0xff] }
 0x211   : > { %1102 = vmatpush.xpose.msk.msra.mxu2 %vm1668_vm0, %v529_v29  ;;  %vm587_vm0 = vmor %vm585_vm3, %vm586_vm2  ;;  %vm1862_vm3 = vcmask 261120  }
 0x212   : > { %v588_v5 = vsel %vm587_vm0, %v1219_v49, %v584_v2  ;;  %v724_v49 = vld [vmem:[#allocation2 + $0x40] sm:$0xff]  ;;  %vm775_vm0 = vcmask 64512  }
 0x213   : > { %618 = vmatpush.xpose.msrb.mxu1 %v591_v62  ;;  %v636_v7 = vmul.f32 %v588_v5, %v1517_v40 }
 0x215   : > { %1104 = vmatpush.xpose.msk.msra.mxu2 %vm1683_vm9, %v1630_v31  ;;  %vm1765_vm9 = vmand %vm663_vm4, %vm665_vm5 }
 0x216   : > { %vm671_vm12 = vmor %vm1765_vm9, %vm670_vm11  ;;  %vm876_vm11 = vcmp.lt.s32.totalorder %v1759_v15, 4 }
 0x217   : > { %619 = vmatpush.xpose.msrb.mxu1 %v590_v3 }
 0x219   : > { %1106 = vmatpush.xpose.msk.msra.mxu2 %vm1696_vm14, %v1648_v35 }
 0x21b   : > { %620 = vmatpush.xpose.msrb.mxu1 %v589_v6 }
 0x21c   : > { %653 = vmatmul.f32.vlgmr.msra.gmra.mxu2 %v636_v7 }
 0x21e   : > { %621 = vmatmul.f32.vlgmr.msrb.gmra.mxu1 %v1370_v8 }
 0x29b   : > { %v622_v9 = vpop.f32.mrf.mxu1 }
 0x29c   : > { %v625_v10 = vmax.f32 %v622_v9, 1e-16 }
 0x29e   : > { %1220 = vrsqrt.f32 %v625_v10  ;;  %vm632_vm10 = vweird.f32 %v625_v10 }
 0x29f   : > { %v654_v24 = vpop.f32.mrf.mxu2 }
 0x2a4   : > { %v1221_v13 = vpop.eup %1220 }
 0x2a5   : > { %v627_v14 = vmul.f32 %v1221_v13, %v625_v10  ;;  %vm633_vm8 = vweird.f32 %v1221_v13 }
 0x2a6   : > { %vm634_vm13 = vmor %vm632_vm10, %vm633_vm8  ;;  %vm850_vm10 = vcmp.eq.s32.totalorder %v1494_v1, %v1759_v15 }
 0x2a7   : > { %v628_v18 = vmul.f32 %v1221_v13, %v627_v14  ;;  %1142 = vmatpush.msk.msrb.mxu2 %vm850_vm10, %v1370_v8 }
 0x2a9   : > { %v629_v19 = vmul.f32 0.5, %v628_v18 }
 0x2ab   : > { %v630_v20 = vsub.f32 1.5, %v629_v19 }
 0x2ad   : > { %v631_v0 = vmul.f32 %v1221_v13, %v630_v20 }
 0x2af   : > { %v635_v22 = vsel %vm634_vm13, %v1221_v13, %v631_v0 }
 0x2b0   : > { %v657_v23 = vperm.slane %v635_v22, 0 }
 0x2b2   : > { %v658_v25 = vmul.f32 %v657_v23, %v654_v24 }
 0x2b4   : > { %v672_v26 = vsel %vm671_vm12, %v658_v25, -1e+30 }
 0x2b5   : > { %673 = vmax.xlane.f32.xlu2 %v672_v26 }
 0x328   : > { %v674_v27 = vpop.xlane.xlu2 %673 }
 0x329   : > { %v675_v28 = vsub.f32 %v658_v25, %v674_v27 }
 0x32b   : > { %v676_v29 = vmul.f32 1.442695, %v675_v28 }
 0x32d   : > { %1222 = vpow2.f32 %v676_v29 }
 0x333   : > { %v1223_v30 = vpop.eup %1222 }
 0x334   : > { %v678_v31 = vsel %vm671_vm12, %v1223_v30, 0.0 }
 0x335   : > { %679 = vadd.xlane.f32.xlu2 %v678_v31 }
 0x3a8   : > { %v680_v35 = vpop.xlane.xlu2 %679 }
 0x3a9   : > { %1224 = vrcp.f32 %v680_v35  ;;  %v692_v39 = vand.u32 2147483648, %v680_v35  ;;  %v690_v42 = vand.u32 2147483647, %v680_v35  ;;  %vm686_vm14 = vweird.f32 %v680_v35 }
 0x3ab   : > { %v693_v44 = vor.u32 1.1754944e-38, %v692_v39  ;;  %vm691_vm2 = vcmp.eq.f32.partialorder %v690_v42, 8.507059e+37 }
 0x3af   : > { %v1225_v36 = vpop.eup %1224 }
 0x3b0   : > { %v682_v37 = vmul.f32 %v1225_v36, %v680_v35  ;;  %vm687_vm15 = vweird.f32 %v1225_v36 }
 0x3b1   : > { %vm688_vm1 = vmor %vm686_vm14, %vm687_vm15 }
 0x3b2   : > { %v683_v38 = vsub.f32 1.0, %v682_v37 }
 0x3b4   : > { %v684_v41 = vmul.f32 %v1225_v36, %v683_v38 }
 0x3b6   : > { %v685_v43 = vadd.f32 %v1225_v36, %v684_v41 }
 0x3b8   : > { %v689_v45 = vsel %vm688_vm1, %v1225_v36, %v685_v43 }
 0x3b9   : > { %v694_v46 = vsel %vm691_vm2, %v693_v44, %v689_v45 }
 0x3ba   : > { %v695_v47 = vmul.f32 %v694_v46, %v678_v31 }
 0x3bc   : > { %712 = vmatmul.f32.vlgmr.msra.gmra.mxu3 %v695_v47 }
 0x3bd   : > { %764 = vmatpush.msra.mxu3 %v724_v49 }
 0x3bf   : > { %765 = vmatpush.msra.mxu3 %v723_v52 }
 0x3c1   : > { %766 = vmatpush.msra.mxu3 %v722_v53 }
 0x3c3   : > { %767 = vmatpush.msra.mxu3 %v721_v54 }
 0x43f   : > { %v713_v50 = vpop.f32.mrf.mxu3 }
 0x440   : > { %v714_v51 = vadd.f32 %v713_v50, %v1517_v40 }
 0x442   : > { %743 = vmatmul.f32.vlgmr.msrb.gmra.mxu3 %v714_v51 }
 0x4c5   : > { %v744_v56 = vpop.f32.mrf.mxu3 }
 0x4c6   : > { %v745_v57 = vadd.f32 %v1216_v55, %v744_v56 }
 0x4c8   : > { %v747_v58 = vmax.f32 %v745_v57, 0.0 }
 0x4ca   : > { %1139 = vmatmul.msk.f32.vlgmr.msra.gmra.mxu3 %vm1862_vm3, %v747_v58 }
 0x54d   : > { %v769_v60 = vpop.f32.mrf.mxu3 }
 0x54e   : > { %v770_v61 = vadd.f32 %v1217_v59, %v769_v60 }
 0x550   : > { %v772_v62 = vadd.f32 %v770_v61, %v1517_v40 }
 0x552   : > { %794 = vmatpush.msrb.mxu3 %v772_v62  ;;  %v800_v2 = vmul.f32 %v772_v62, %v772_v62  ;;  %773 = vst [vmem:[%s1775_s30] sm:$0xff] %v772_v62 }
 0x553   : > { %1140 = vmatmul.msk.f32.vlgmr.msrb.gmra.mxu3 %vm775_vm0, %v774_v63 }
 0x554   : > { %801 = vadd.xlane.f32.xlu0 %v800_v2 }
 0x5c7   : > { %v802_v6 = vpop.xlane.xlu0 %801 }
 0x5c8   : > { %v803_v7 = vmax.f32 %v802_v6, 1e-16 }
 0x5ca   : > { %1226 = vrsqrt.f32 %v803_v7  ;;  %vm810_vm7 = vweird.f32 %v803_v7 }
 0x5d0   : > { %v1227_v9 = vpop.eup %1226 }
 0x5d1   : > { %v805_v10 = vmul.f32 %v1227_v9, %v803_v7  ;;  %vm811_vm5 = vweird.f32 %v1227_v9 }
 0x5d2   : > { %vm812_vm9 = vmor %vm810_vm7, %vm811_vm5 }
 0x5d3   : > { %v806_v12 = vmul.f32 %v1227_v9, %v805_v10 }
 0x5d5   : > { %v807_v14 = vmul.f32 0.5, %v806_v12 }
 0x5d6   : > { %v796_v3 = vpop.f32.mrf.mxu3 }
 0x5d7   : > { %v799_v4 = vmul.f32 0.5, %v796_v3  ;;  %v808_v18 = vsub.f32 1.5, %v807_v14 }
 0x5d9   : > { %v814_v5 = vmul.f32 %v799_v4, %v799_v4  ;;  %v809_v21 = vmul.f32 %v1227_v9, %v808_v18 }
 0x5db   : > { %815 = vadd.xlane.f32.xlu2 %v814_v5  ;;  %v813_v23 = vsel %vm812_vm9, %v1227_v9, %v809_v21 }
 0x5dc   : > { %v828_v25 = vmul.f32 %v813_v23, %v772_v62 }
 0x64e   : > { %v816_v40 = vpop.xlane.xlu2 %815 }
 0x64f   : > { %v817_v11 = vmax.f32 %v816_v40, 1e-16 }
 0x651   : > { %1228 = vrsqrt.f32 %v817_v11  ;;  %vm824_vm6 = vweird.f32 %v817_v11 }
 0x657   : > { %v1229_v13 = vpop.eup %1228 }
 0x658   : > { %v819_v16 = vmul.f32 %v1229_v13, %v817_v11  ;;  %vm825_vm4 = vweird.f32 %v1229_v13 }
 0x659   : > { %vm826_vm8 = vmor %vm824_vm6, %vm825_vm4 }
 0x65a   : > { %v820_v17 = vmul.f32 %v1229_v13, %v819_v16 }
 0x65c   : > { %v821_v19 = vmul.f32 0.5, %v820_v17 }
 0x65e   : > { %v822_v20 = vsub.f32 1.5, %v821_v19 }
 0x660   : > { %v823_v0 = vmul.f32 %v1229_v13, %v822_v20 }
 0x662   : > { %v827_v22 = vsel %vm826_vm8, %v1229_v13, %v823_v0 }
 0x663   : > { %v829_v24 = vmul.f32 %v827_v22, %v799_v4 }
 0x665   : > { %845 = vmatpush.xpose.msra.mxu1 %v829_v24 }
 0x668   : > { %846 = vmatmul.f32.vlgmr.msra.gmra.mxu1 %v828_v25 }
 0x6e5   : > { %v847_v26 = vpop.f32.mrf.mxu1 }
 0x6e6   : > { %1143 = vmatmul.msk.f32.vlgmr.msrb.gmra.mxu2 %vm775_vm0, %v847_v26 }
 0x769   : > { %v873_v27 = vpop.f32.mrf.mxu2 }
 0x76a   : > { %v877_v28 = vsel %vm876_vm11, %v873_v27, -1e+30 }
 0x76b   : > { %878 = vmax.xlane.f32.xlu1 %v877_v28 }
 0x7de   : > { %v879_v29 = vpop.xlane.xlu1 %878 }
 0x7df   : > { %v880_v30 = vsub.f32 %v873_v27, %v879_v29 }
 0x7e1   : > { %v881_v31 = vmul.f32 1.442695, %v880_v30 }
 0x7e3   : > { %1230 = vpow2.f32 %v881_v31 }
 0x7e9   : > { %v1231_v32 = vpop.eup %1230 }
 0x7ea   : > { %v883_v33 = vsel %vm876_vm11, %v1231_v32, 0.0 }
 0x7eb   : > { %884 = vadd.xlane.f32.xlu2 %v883_v33 }
 0x7ec   : > { %1321 = shalt.err (!%p1318_p8)
}
 0x7ed   : > { %1158 = dma.vmem_to_hbm [thread:$0]  (%p1450_p12), %s920_s22, 128, %s922_s23, %s903_s24  }
 0x7ee   : > { %p212_p9 = scmp.lt.s32.totalorder %s1415_s19, 3 }
 0x7f0   : > { %s1868_s19 = smov (!%p212_p9, %s1415_s19), 3 }
 0x7f1   : > { %s1041_s5 = sshll.u32 %s1868_s19, 3 }
 0x7f2   : > { %s215_s20 = scalar_lea.vmem %s1825_s3, %s1041_s5 }
 0x85e   : > { %v885_v1 = vpop.xlane.xlu2 %884 }
 0x85f   : > { %1232 = vrcp.f32 %v885_v1  ;;  %v897_v35 = vand.u32 2147483648, %v885_v1  ;;  %v895_v37 = vand.u32 2147483647, %v885_v1  ;;  %vm891_vm12 = vweird.f32 %v885_v1 }
 0x861   : > { %v898_v39 = vor.u32 1.1754944e-38, %v897_v35  ;;  %vm896_vm14 = vcmp.eq.f32.partialorder %v895_v37, 8.507059e+37 }
 0x865   : > { %v1233_v8 = vpop.eup %1232 }
 0x866   : > { %v887_v15 = vmul.f32 %v1233_v8, %v885_v1  ;;  %vm892_vm13 = vweird.f32 %v1233_v8 }
 0x867   : > { %vm893_vm15 = vmor %vm891_vm12, %vm892_vm13 }
 0x868   : > { %v888_v34 = vsub.f32 1.0, %v887_v15 }
 0x86a   : > { %v889_v36 = vmul.f32 %v1233_v8, %v888_v34 }
 0x86c   : > { %v890_v38 = vadd.f32 %v1233_v8, %v889_v36 }
 0x86e   : > { %v894_v41 = vsel %vm893_vm15, %v1233_v8, %v890_v38 }
 0x86f   : > { %v899_v42 = vsel %vm896_vm14, %v898_v39, %v894_v41 }
 0x870   : > { %v900_v43 = vmul.f32 %v899_v42, %v883_v33 }
 0x872   : > { %901 = vst [vmem:[%s215_s20] sm:$0xff] %v900_v43 }
 0x873 PF: > { %p1175_p12 = scmp.ge.s32.totalorder %s1364_s15, 2  ;;  %s936_s30 = sand.u32 1, %s1352_s12  }
 0x874   : > { %s937_s19 = scalar_lea.sflag [#allocation4], %s936_s30 }
 0x875   : > { %p1169_p10 = pnand %p1175_p12, %p1455_p2 }
 0x877   : > { %p1170_p13 = pneg %p1169_p10 }
 0x879   : > { %1347 = dma.done.wait (%p1170_p13), %s937_s19, 128  }
 0x87a   : > { %1349 = vsyncadd (%p1170_p13), %s937_s19, 4294967168  ;;  %p18_p0 = scmp.ge.s32.totalorder %s1430_s26, 6   ;;  %s1863_s12 = smov %s1356_s13 }
 0x87b   : > { %s1864_s13 = smov %s1360_s14  ;;  %s1865_s14 = smov %s1442_s29 }
 0x87c   : > { %s1866_s15 = smov %s1430_s26  ;;  %20 = sbr.rel (!%p18_p0) target bundleno = 6 (0x6), region = 90 }
 0x881   :  { %950 = vsyncpa [#allocation3], 1 }
 0x882   :  { %952 = vsyncpa [#allocation3 + $0x1], 1 }
 0x883   :  { %953 = vsyncpa [#allocation6], 1 }
 0x884   :  { %955 = vsyncpa [#allocation6 + $0x1], 1 }
 0x885   :  { %956 = vsyncpa [#allocation4], 1 }
 0x886   :  { %958 = vsyncpa [#allocation4 + $0x1], 1 }

</bundles_post_ra>
